<compile_context>
chip_gen: v6e
topology: v6e:2x2x1
jax: 0.10.0
libtpu: 0.0.40
codegen_flags: <defaults>
</compile_context>

<pallas_src>
import jax
import jax.numpy as jnp
import numpy as np
from jax.experimental import pallas as pl
from jax.experimental.pallas import tpu as pltpu

IMG_SIZE = 32
IN_FEATURES = IMG_SIZE * IMG_SIZE   # 1024
H1 = 64
H1_PAD = 128                        # lane-dense padded hidden width
H2 = 8
OUT = 7                             # fc3 exists in the module but is dead in forward()

MAX_TILE_B = 2048                   # 2 x 8 MiB double-buffered f32 x tile
VMEM_LIMIT_BYTES = 32 * 1024 * 1024 # <= physical VMEM on v5e/v6e/v7x


def _mlp_kernel(x_ref, w1_ref, b1_ref, w2_ref, b2_ref, act_ref):
    # x: (TILE_B, 1024) f32; w1: (1024, 128) bf16; b1: (1, 128) f32;
    # w2: (128, 8) bf16; b2: (1, 8) f32; act: (TILE_B, 8) f32.
    # Deliberate bf16 MXU operands with f32 accumulation (HBM-bound regime).
    x = x_ref[...].astype(jnp.bfloat16)

    # fc1 + relu -> (TILE_B, 128); columns 64..127 are exactly zero.
    h1 = jnp.dot(x, w1_ref[...], preferred_element_type=jnp.float32) + b1_ref[...]
    h1 = jnp.maximum(h1, 0.0)

    # fc2 + relu -> (TILE_B, 8); padded rows of w2 are zero => exact.
    h2 = jnp.dot(h1.astype(jnp.bfloat16), w2_ref[...],
                 preferred_element_type=jnp.float32) + b2_ref[...]
    act_ref[...] = jnp.maximum(h2, 0.0).astype(act_ref.dtype)


def prepare_params(params):
    """One-time prep: (out,in) PyTorch weights -> (in,out) bf16, H1 padded to 128."""
    w1, b1, w2, b2, _w3, _b3 = params  # fc3 dropped: dead in forward()
    w1p = (jnp.zeros((IN_FEATURES, H1_PAD), jnp.float32)
           .at[:, :H1].set(jnp.asarray(w1, jnp.float32).T)
           .astype(jnp.bfloat16))
    b1p = jnp.zeros((1, H1_PAD), jnp.float32).at[:, :H1].set(
        jnp.asarray(b1, jnp.float32).reshape(1, H1))
    w2p = (jnp.zeros((H1_PAD, H2), jnp.float32)
           .at[:H1, :].set(jnp.asarray(w2, jnp.float32).T)
           .astype(jnp.bfloat16))
    b2p = jnp.asarray(b2, jnp.float32).reshape(1, H2)
    return (w1p, b1p, w2p, b2p)


def _pick_tile_b(rows):
    """Batch tile: sublane-rounded, capped at MAX_TILE_B, >=2 grid steps when possible."""
    round8 = lambda n: -(-n // 8) * 8
    if rows <= 8:
        return 8
    # At least 2 grid steps so v7x's two TensorCores both get work ("parallel" axis).
    return min(MAX_TILE_B, round8(pl.cdiv(rows, 2)))


@jax.jit
def mlp_forward(x, prepared_params):
    """x: (B, 1, 32, 32) or anything reshapeable to (-1, 1024). Returns (B, 8)."""
    w1p, b1p, w2p, b2p = prepared_params
    x2d = jnp.reshape(x, (-1, IN_FEATURES)).astype(jnp.float32)
    batch = x2d.shape[0]

    # Tiny-batch guard only (batch < 8): pad to one sublane (<= 28 KiB copy).
    # Large ragged batches use the cdiv grid with a masked boundary block —
    # no full-array jnp.pad copy of x (perf feedback).
    rows = batch
    if batch < 8:
        x2d = jnp.pad(x2d, ((0, 8 - batch), (0, 0)))
        rows = 8

    tile_b = _pick_tile_b(rows)
    grid = (pl.cdiv(rows, tile_b),)

    weight_bytes = (IN_FEATURES * H1_PAD + H1_PAD * H2) * 2 + (H1_PAD + H2) * 4
    cost = pl.CostEstimate(
        flops=2 * rows * IN_FEATURES * H1_PAD + 2 * rows * H1_PAD * H2,
        bytes_accessed=rows * IN_FEATURES * 4 + rows * H2 * 4 + weight_bytes,
        transcendentals=0,
    )

    act = pl.pallas_call(
        _mlp_kernel,
        out_shape=jax.ShapeDtypeStruct((rows, H2), jnp.float32),
        grid=grid,
        in_specs=[
            pl.BlockSpec((tile_b, IN_FEATURES), lambda i: (i, 0)),   # x tile (streamed)
            pl.BlockSpec((IN_FEATURES, H1_PAD), lambda i: (0, 0)),   # w1 (resident)
            pl.BlockSpec((1, H1_PAD), lambda i: (0, 0)),             # b1 (resident)
            pl.BlockSpec((H1_PAD, H2), lambda i: (0, 0)),            # w2 (resident)
            pl.BlockSpec((1, H2), lambda i: (0, 0)),                 # b2 (resident)
        ],
        out_specs=pl.BlockSpec((tile_b, H2), lambda i: (i, 0)),
        compiler_params=pltpu.CompilerParams(
            dimension_semantics=("parallel",),
            vmem_limit_bytes=VMEM_LIMIT_BYTES,
        ),
        cost_estimate=cost,
    )(x2d, w1p, b1p, w2p, b2p)

    # Reference forward returns the post-relu fc2 activation, shape (B, 8).
    return act[:batch]


def init_params(key):
    """Deterministic PyTorch-style init: U(-1/sqrt(fan_in), 1/sqrt(fan_in))."""
    keys = jax.random.split(key, 6)

    def linear(kw, kb, fan_in, fan_out):
        bound = 1.0 / float(np.sqrt(fan_in))
        w = jax.random.uniform(kw, (fan_out, fan_in), jnp.float32, -bound, bound)
        b = jax.random.uniform(kb, (fan_out,), jnp.float32, -bound, bound)
        return w, b

    w1, b1 = linear(keys[0], keys[1], IN_FEATURES, H1)
    w2, b2 = linear(keys[2], keys[3], H1, H2)
    w3, b3 = linear(keys[4], keys[5], H2, OUT)
    return (w1, b1, w2, b2, w3, b3)


def _reference(x, params, bf16=True):
    """Pure-JAX/NumPy reference. bf16=True matches the kernel's pinned precision."""
    w1, b1, w2, b2, _w3, _b3 = params
    xf = jnp.reshape(x, (-1, IN_FEATURES)).astype(jnp.float32)
    if bf16:
        h1 = jnp.dot(xf.astype(jnp.bfloat16), w1.T.astype(jnp.bfloat16),
                     preferred_element_type=jnp.float32) + b1
        h1 = jnp.maximum(h1, 0.0)
        h2 = jnp.dot(h1.astype(jnp.bfloat16), w2.T.astype(jnp.bfloat16),
                     preferred_element_type=jnp.float32) + b2
        return jnp.maximum(h2, 0.0)
    # True f32 reference on host (PyTorch-equivalent numerics).
    xn = np.asarray(xf, np.float32)
    h1 = np.maximum(xn @ np.asarray(w1, np.float32).T + np.asarray(b1, np.float32), 0.0)
    h2 = np.maximum(h1 @ np.asarray(w2, np.float32).T + np.asarray(b2, np.float32), 0.0)
    return h2


if __name__ == "__main__":
    key = jax.random.PRNGKey(0)
    k_params, k_x = jax.random.split(key)

    params = init_params(k_params)
    prepared = prepare_params(params)   # one-time weight transpose/pad/bf16 (outside jit)

    # Small NCHW batch of single-channel 32x32 images (the flatten implies 1024 features).
    x = jax.random.normal(k_x, (8, 1, IMG_SIZE, IMG_SIZE), dtype=jnp.float32)

    out = jax.block_until_ready(mlp_forward(x, prepared))
    assert out.shape == (8, H2), out.shape

    # Tight check vs a reference using the same pinned precision (bf16 operands, f32 acc).
    ref_bf16 = _reference(x, params, bf16=True)
    assert jnp.allclose(out, ref_bf16, atol=1e-3, rtol=1e-3), "mismatch vs bf16 reference"
    # Loose sanity check vs the exact-f32 PyTorch-style reference.
    ref_f32 = _reference(x, params, bf16=False)
    assert np.allclose(np.asarray(out), ref_f32, atol=3e-2, rtol=3e-2), "mismatch vs f32 reference"

    # Ragged batch (not a multiple of the sublane width): exercises the masked
    # boundary block path — no full jnp.pad copy of x.
    x_odd = jax.random.normal(jax.random.PRNGKey(1), (13, 1, IMG_SIZE, IMG_SIZE),
                              dtype=jnp.float32)
    out_odd = jax.block_until_ready(mlp_forward(x_odd, prepared))
    assert out_odd.shape == (13, H2), out_odd.shape
    ref_odd = _reference(x_odd, params, bf16=True)
    assert jnp.allclose(out_odd, ref_odd, atol=1e-3, rtol=1e-3), "odd-batch mismatch"

    print("KERNEL_OK")
</pallas_src>

<mosaic_0001>
module attributes {stable_mosaic.version = 11 : i64} {
  func.func @_mlp_kernel(%arg0: i32, %arg1: memref<8x1024xf32, #tpu.memory_space<vmem>>, %arg2: memref<1024x128xbf16, #tpu.memory_space<vmem>>, %arg3: memref<1x128xf32, #tpu.memory_space<vmem>>, %arg4: memref<128x8xbf16, #tpu.memory_space<vmem>>, %arg5: memref<1x8xf32, #tpu.memory_space<vmem>>, %arg6: memref<8x8xf32, #tpu.memory_space<vmem>>) attributes {dimension_semantics = [#tpu.dimension_semantics<parallel>], iteration_bounds = array<i64: 1>, scalar_prefetch = 0 : i64, scratch_operands = 0 : i64, tpu.core_type = #tpu.core_type<tc>, window_params = [{transform_indices = @transform_0, window_bounds = array<i64: 8, 1024>}, {pipeline_mode = #tpu.pipeline_mode<synchronous>, transform_indices = @transform_1, window_bounds = array<i64: 1024, 128>}, {pipeline_mode = #tpu.pipeline_mode<synchronous>, transform_indices = @transform_2, window_bounds = array<i64: 1, 128>}, {pipeline_mode = #tpu.pipeline_mode<synchronous>, transform_indices = @transform_3, window_bounds = array<i64: 128, 8>}, {pipeline_mode = #tpu.pipeline_mode<synchronous>, transform_indices = @transform_4, window_bounds = array<i64: 1, 8>}, {transform_indices = @transform_5, window_bounds = array<i64: 8, 8>}]} {
    %c0 = arith.constant 0 : index
    %c0_0 = arith.constant 0 : index
    %0 = vector.load %arg1[%c0, %c0_0] : memref<8x1024xf32, #tpu.memory_space<vmem>>, vector<8x1024xf32>
    %1 = arith.truncf %0 : vector<8x1024xf32> to vector<8x1024xbf16>
    %c0_1 = arith.constant 0 : index
    %c0_2 = arith.constant 0 : index
    %2 = vector.load %arg2[%c0_1, %c0_2] : memref<1024x128xbf16, #tpu.memory_space<vmem>>, vector<1024x128xbf16>
    %cst = arith.constant dense<0.000000e+00> : vector<8x128xf32>
    %3 = tpu.matmul %1, %2, %cst {dimension_numbers = #tpu.dot_dimension_numbers<[1], [0], [0], [1], [0, 0, 1, 1], [], []>} : vector<8x1024xbf16>, vector<1024x128xbf16>, vector<8x128xf32> -> vector<8x128xf32>
    %c0_3 = arith.constant 0 : index
    %c0_4 = arith.constant 0 : index
    %4 = vector.load %arg3[%c0_3, %c0_4] : memref<1x128xf32, #tpu.memory_space<vmem>>, vector<1x128xf32>
    %5 = vector.broadcast %4 : vector<1x128xf32> to vector<8x128xf32>
    %6 = arith.addf %3, %5 : vector<8x128xf32>
    %cst_5 = arith.constant 0.000000e+00 : f32
    %7 = vector.broadcast %cst_5 : f32 to vector<8x128xf32>
    %8 = arith.maximumf %6, %7 : vector<8x128xf32>
    %9 = arith.truncf %8 : vector<8x128xf32> to vector<8x128xbf16>
    %c0_6 = arith.constant 0 : index
    %c0_7 = arith.constant 0 : index
    %10 = vector.load %arg4[%c0_6, %c0_7] : memref<128x8xbf16, #tpu.memory_space<vmem>>, vector<128x8xbf16>
    %cst_8 = arith.constant dense<0.000000e+00> : vector<8x8xf32>
    %11 = tpu.matmul %9, %10, %cst_8 {dimension_numbers = #tpu.dot_dimension_numbers<[1], [0], [0], [1], [0, 0, 1, 1], [], []>} : vector<8x128xbf16>, vector<128x8xbf16>, vector<8x8xf32> -> vector<8x8xf32>
    %c0_9 = arith.constant 0 : index
    %c0_10 = arith.constant 0 : index
    %12 = vector.load %arg5[%c0_9, %c0_10] : memref<1x8xf32, #tpu.memory_space<vmem>>, vector<1x8xf32>
    %13 = vector.broadcast %12 : vector<1x8xf32> to vector<8x8xf32>
    %14 = arith.addf %11, %13 : vector<8x8xf32>
    %cst_11 = arith.constant 0.000000e+00 : f32
    %15 = vector.broadcast %cst_11 : f32 to vector<8x8xf32>
    %16 = arith.maximumf %14, %15 : vector<8x8xf32>
    %c0_12 = arith.constant 0 : index
    %c0_13 = arith.constant 0 : index
    %17 = vector.load %arg6[%c0_12, %c0_13] : memref<8x8xf32, #tpu.memory_space<vmem>>, vector<8x8xf32>
    tpu.vector_store %arg6[%c0_12, %c0_13], %16 {strides = array<i32>} : memref<8x8xf32, #tpu.memory_space<vmem>>, vector<8x8xf32>,
    return
  }
  func.func @transform_0(%arg0: i32) -> (i32, i32) {
    %c0_i32 = arith.constant 0 : i32
    %c0_i32_0 = arith.constant 0 : i32
    return %arg0, %c0_i32 : i32, i32
  }
  func.func @transform_1(%arg0: i32) -> (i32, i32) {
    %c0_i32 = arith.constant 0 : i32
    %c0_i32_0 = arith.constant 0 : i32
    %c0_i32_1 = arith.constant 0 : i32
    return %c0_i32, %c0_i32_0 : i32, i32
  }
  func.func @transform_2(%arg0: i32) -> (i32, i32) {
    %c0_i32 = arith.constant 0 : i32
    %c0_i32_0 = arith.constant 0 : i32
    %c0_i32_1 = arith.constant 0 : i32
    return %c0_i32, %c0_i32_0 : i32, i32
  }
  func.func @transform_3(%arg0: i32) -> (i32, i32) {
    %c0_i32 = arith.constant 0 : i32
    %c0_i32_0 = arith.constant 0 : i32
    %c0_i32_1 = arith.constant 0 : i32
    return %c0_i32, %c0_i32_0 : i32, i32
  }
  func.func @transform_4(%arg0: i32) -> (i32, i32) {
    %c0_i32 = arith.constant 0 : i32
    %c0_i32_0 = arith.constant 0 : i32
    %c0_i32_1 = arith.constant 0 : i32
    return %c0_i32, %c0_i32_0 : i32, i32
  }
  func.func @transform_5(%arg0: i32) -> (i32, i32) {
    %c0_i32 = arith.constant 0 : i32
    %c0_i32_0 = arith.constant 0 : i32
    return %arg0, %c0_i32 : i32, i32
  }
}

</mosaic_0001>

<bundles_post_ra>
// kernel: mlp_forward.1
= control target key start
LH: loop header
LB: loop body
LE: loop exit
PB: predicated region body
PF: predicated region fallthrough
CT: control target
= control target key end

     0   :  { %10 = vsyncpa [#allocation3], 0  ;;  %s1271_s0 = inlined_call_operand.vmem [shape: f32[8,1024], index: 0, kind: input, shape index: {}]   ;;  %s1272_s1 = inlined_call_operand.hbm [shape: bf16[1024,128], index: 1, kind: input, shape index: {}]   ;;  %s1273_s2 = inlined_call_operand.vmem [shape: f32[1,128], index: 2, kind: input, shape index: {}]   ;;  %s1274_s3 = inlined_call_operand.vmem [shape: bf16[128,8], index: 3, kind: input, shape index: {}]   ;;  %s1275_s4 = inlined_call_operand.vmem [shape: f32[1,8], index: 4, kind: input, shape index: {}]   ;;  %s1276_s5 = inlined_call_operand.hbm [shape: f32[8,8], index: 5, kind: output, shape index: {}]  }
   0x1   :  { %11 = vsyncpa [#allocation4], 0  ;;  %s1175_s18 = smov [#allocation2]  }
   0x2   :  { %s19_s19 = sshll.u32 %s1175_s18, 4  ;;  %s20_s19 = int_to_ptr.vmem [resolvable:$true] %s19_s19 }
   0x3   :  { %s1139_s20 = scalar_lea.vmem %s20_s19, 8192  ;;  %p1144_p1 = scmp.lt.s32.totalorder %s20_s19, %s20_s19 }
   0x4   :  { %p1140_p0 = scmp.ne.s32.totalorder %s20_s19, %s1139_s20  ;;  %p1145_p2 = scmp.lt.s32.totalorder %s1139_s20, %s1139_s20 }
   0x6   :  { %p1146_p3 = por %p1145_p2, %p1144_p1 }
   0x8   :  { %p1147_p4 = pnand %p1146_p3, %p1140_p0 }
   0xa   :  { %1150 = shalt.err (!%p1147_p4)
}
   0xb   :  { %s1176_s21 = smov 64   ;;  %s1177_s22 = smov 4  }
   0xc   :  { %25 = dma.hbm_to_vmem [thread:$0]  %s1272_s1, 8192, %s20_s19, [#allocation3], %s1176_s21, %s1176_s21, %s1177_s22  }
   0xd   :  { %1171 = dma.done.wait [#allocation3], 8192  }
   0xe   :  { %1172 = vsyncadd [#allocation3], 4294959104  ;;  %v1059_v0 = vld [vmem:[#allocation2 + $0x78] sm:$0xff]   ;;  %v1063_v4 = vld [vmem:[#allocation2 + $0x70] sm:$0xff]   ;;  %vm1179_vm0 = vmmov 0   ;;  %s1180_s6 = smov [#allocation5]  }
   0xf   :  { %v1060_v1 = vld [vmem:[#allocation2 + $0xf8] sm:$0xff]   ;;  %936 = vmatprep.subr.bf16.mxu0 %v1059_v0  ;;  %v1064_v5 = vld [vmem:[#allocation2 + $0xf0] sm:$0xff]   ;;  %v1067_v8 = vld [vmem:[#allocation2 + $0x68] sm:$0xff]   ;;  %s853_s7 = sshll.u32 %s1180_s6, 4  ;;  %vm845_vm1 = vcmask 64512   ;;  %s854_s7 = int_to_ptr.vmem [resolvable:$true] %s853_s7 }
  0x10   :  { %v1061_v2 = vld [vmem:[#allocation2 + $0x38] sm:$0xff]   ;;  %958 = vmatprep.subr.bf16.mxu1 %v1060_v1  ;;  %v1065_v6 = vld [vmem:[#allocation2 + $0x30] sm:$0xff]   ;;  %v1068_v9 = vld [vmem:[#allocation2 + $0xe8] sm:$0xff]   ;;  %s1151_s8 = scalar_lea.vmem %s854_s7, 128  ;;  %p1156_p6 = scmp.lt.s32.totalorder %s854_s7, %s854_s7 }
  0x11   :  { %v1062_v3 = vld [vmem:[#allocation2 + $0xb8] sm:$0xff]   ;;  %937 = vmatpush3.bf16.msra.mxu0 %v1061_v2  ;;  %v1066_v7 = vld [vmem:[#allocation2 + $0xb0] sm:$0xff]   ;;  %v1069_v10 = vld [vmem:[#allocation2 + $0x28] sm:$0xff]   ;;  %p1152_p5 = scmp.ne.s32.totalorder %s854_s7, %s1151_s8  ;;  %p1157_p7 = scmp.lt.s32.totalorder %s1151_s8, %s1151_s8 }
  0x12   :  { %959 = vmatpush3.bf16.msra.mxu1 %v1062_v3  ;;  %938 = vmatprep.subr.bf16.mxu0 %v1063_v4  ;;  %v1070_v11 = vld [vmem:[#allocation2 + $0xa8] sm:$0xff]   ;;  %v1071_v12 = vld [vmem:[#allocation2 + $0x60] sm:$0xff]   ;;  %v1075_v16 = vld [vmem:[#allocation2 + $0x58] sm:$0xff]  }
  0x13   :  { %960 = vmatprep.subr.bf16.mxu1 %v1064_v5  ;;  %v1072_v13 = vld [vmem:[#allocation2 + $0xe0] sm:$0xff]   ;;  %v1076_v17 = vld [vmem:[#allocation2 + $0xd8] sm:$0xff]   ;;  %v1079_v20 = vld [vmem:[#allocation2 + $0x50] sm:$0xff]   ;;  %p1158_p8 = por %p1157_p7, %p1156_p6 }
  0x14   :  { %v1073_v14 = vld [vmem:[#allocation2 + $0x20] sm:$0xff]   ;;  %v1077_v18 = vld [vmem:[#allocation2 + $0x18] sm:$0xff]   ;;  %v1080_v21 = vld [vmem:[#allocation2 + $0xd0] sm:$0xff]  }
  0x15   :  { %939 = vmatpush3.bf16.msra.mxu0 %v1065_v6  ;;  %v1074_v15 = vld [vmem:[#allocation2 + $0xa0] sm:$0xff]   ;;  %v1078_v19 = vld [vmem:[#allocation2 + $0x98] sm:$0xff]   ;;  %v1081_v22 = vld [vmem:[#allocation2 + $0x10] sm:$0xff]   ;;  %p1159_p9 = pnand %p1158_p8, %p1152_p5 }
  0x16   :  { %961 = vmatpush3.bf16.msra.mxu1 %v1066_v7  ;;  %940 = vmatprep.subr.bf16.mxu0 %v1067_v8  ;;  %v1082_v23 = vld [vmem:[#allocation2 + $0x90] sm:$0xff]   ;;  %v1083_v24 = vld [vmem:[#allocation2 + $0x48] sm:$0xff]   ;;  %v1087_v28 = vld [vmem:[#allocation2 + $0x40] sm:$0xff]  }
  0x17   :  { %962 = vmatprep.subr.bf16.mxu1 %v1068_v9  ;;  %v1084_v25 = vld [vmem:[#allocation2 + $0xc8] sm:$0xff]   ;;  %v1088_v29 = vld [vmem:[#allocation2 + $0xc0] sm:$0xff]   ;;  %v39_v33 = vld [vmem:[%s1271_s0 + $0x18] sm:$0xff] }
  0x18   :  { %v1085_v26 = vld [vmem:[#allocation2 + $0x8] sm:$0xff]   ;;  %v1089_v30 = vld [vmem:[#allocation2] sm:$0xff]   ;;  %v47_v36 = vpack.c.bf16 %v39_v33, %v39_v33  ;;  %v38_v38 = vld [vmem:[%s1271_s0 + $0x10] sm:$0xff] }
  0x19   :  { %941 = vmatpush3.bf16.msra.mxu0 %v1069_v10  ;;  %v1086_v27 = vld [vmem:[#allocation2 + $0x88] sm:$0xff]   ;;  %v1090_v31 = vld [vmem:[#allocation2 + $0x80] sm:$0xff]   ;;  %v46_v39 = vpack.c.bf16 %v38_v38, %v38_v38  ;;  %v1091_v40 = vld [vmem:[#allocation2 + $0x178] sm:$0xff]  }
  0x1a   :  { %963 = vmatpush3.bf16.msra.mxu1 %v1070_v11  ;;  %942 = vmatprep.subr.bf16.mxu0 %v1071_v12  ;;  %v37_v32 = vld [vmem:[%s1271_s0 + $0x8] sm:$0xff]  ;;  %v36_v34 = vld [vmem:[%s1271_s0] sm:$0xff]  ;;  %v1092_v41 = vld [vmem:[#allocation2 + $0x1f8] sm:$0xff]  }
  0x1b   :  { %964 = vmatprep.subr.bf16.mxu1 %v1072_v13  ;;  %v45_v35 = vpack.c.bf16 %v37_v32, %v37_v32  ;;  %v44_v37 = vpack.c.bf16 %v36_v34, %v36_v34  ;;  %643 = vmatprep.mubr.bf16.mxu1 %v47_v36  ;;  %v1093_v42 = vld [vmem:[#allocation2 + $0x138] sm:$0xff]   ;;  %v1095_v44 = vld [vmem:[#allocation2 + $0x170] sm:$0xff]   ;;  %v1099_v48 = vld [vmem:[#allocation2 + $0x168] sm:$0xff]  }
  0x1c   :  { %v1094_v43 = vld [vmem:[#allocation2 + $0x1b8] sm:$0xff]   ;;  %v1096_v45 = vld [vmem:[#allocation2 + $0x1f0] sm:$0xff]   ;;  %v1100_v49 = vld [vmem:[#allocation2 + $0x1e8] sm:$0xff]  }
  0x1d   :  { %943 = vmatpush3.bf16.msra.mxu0 %v1073_v14  ;;  %603 = vmatprep.mubr.bf16.mxu0 %v45_v35  ;;  %v1097_v46 = vld [vmem:[#allocation2 + $0x130] sm:$0xff]   ;;  %v1101_v50 = vld [vmem:[#allocation2 + $0x128] sm:$0xff]   ;;  %v1103_v52 = vld [vmem:[#allocation2 + $0x160] sm:$0xff]  }
  0x1e   :  { %965 = vmatpush3.bf16.msra.mxu1 %v1074_v15  ;;  %944 = vmatprep.subr.bf16.mxu0 %v1075_v16  ;;  %v1098_v47 = vld [vmem:[#allocation2 + $0x1b0] sm:$0xff]   ;;  %v1102_v51 = vld [vmem:[#allocation2 + $0x1a8] sm:$0xff]   ;;  %v1104_v53 = vld [vmem:[#allocation2 + $0x1e0] sm:$0xff]  }
  0x1f   :  { %966 = vmatprep.subr.bf16.mxu1 %v1076_v17  ;;  %v1105_v54 = vld [vmem:[#allocation2 + $0x120] sm:$0xff]   ;;  %v1107_v56 = vld [vmem:[#allocation2 + $0x158] sm:$0xff]   ;;  %v1111_v60 = vld [vmem:[#allocation2 + $0x150] sm:$0xff]   ;;  %v1178_v17 = vmov 0.0  }
  0x20   :  { %v1106_v55 = vld [vmem:[#allocation2 + $0x1a0] sm:$0xff]   ;;  %v1108_v57 = vld [vmem:[#allocation2 + $0x1d8] sm:$0xff]   ;;  %v1112_v61 = vld [vmem:[#allocation2 + $0x1d0] sm:$0xff]  }
  0x21   :  { %945 = vmatpush3.bf16.msra.mxu0 %v1077_v18  ;;  %v1109_v58 = vld [vmem:[#allocation2 + $0x118] sm:$0xff]   ;;  %v1113_v62 = vld [vmem:[#allocation2 + $0x110] sm:$0xff]   ;;  %v1115_v0 = vld [vmem:[#allocation2 + $0x148] sm:$0xff]  }
  0x22   :  { %967 = vmatpush3.bf16.msra.mxu1 %v1078_v19  ;;  %946 = vmatprep.subr.bf16.mxu0 %v1079_v20  ;;  %v1110_v59 = vld [vmem:[#allocation2 + $0x198] sm:$0xff]   ;;  %v1114_v63 = vld [vmem:[#allocation2 + $0x190] sm:$0xff]   ;;  %v1116_v1 = vld [vmem:[#allocation2 + $0x1c8] sm:$0xff]  }
  0x23   :  { %968 = vmatprep.subr.bf16.mxu1 %v1080_v21  ;;  %v1117_v2 = vld [vmem:[#allocation2 + $0x108] sm:$0xff]   ;;  %v1119_v4 = vld [vmem:[#allocation2 + $0x140] sm:$0xff]   ;;  %v43_v9 = vld [vmem:[%s1271_s0 + $0x38] sm:$0xff] }
  0x24   :  { %v1118_v3 = vld [vmem:[#allocation2 + $0x188] sm:$0xff]   ;;  %v1120_v5 = vld [vmem:[#allocation2 + $0x1c0] sm:$0xff]   ;;  %v51_v11 = vpack.c.bf16 %v43_v9, %v43_v9  ;;  %v42_v13 = vld [vmem:[%s1271_s0 + $0x30] sm:$0xff] }
  0x25   :  { %947 = vmatpush3.bf16.msra.mxu0 %v1081_v22  ;;  %v1121_v6 = vld [vmem:[#allocation2 + $0x100] sm:$0xff]   ;;  %v41_v8 = vld [vmem:[%s1271_s0 + $0x28] sm:$0xff]  ;;  %v50_v15 = vpack.c.bf16 %v42_v13, %v42_v13  ;;  %v1123_v16 = vld [vmem:[%s1274_s3 + $0x38] sm:$0xff]  }
  0x26   :  { %969 = vmatpush3.bf16.msra.mxu1 %v1082_v23  ;;  %948 = vmatprep.subr.bf16.mxu0 %v1083_v24  ;;  %v1122_v7 = vld [vmem:[#allocation2 + $0x180] sm:$0xff]   ;;  %v49_v10 = vpack.c.bf16 %v41_v8, %v41_v8  ;;  %v1124_v18 = vld [vmem:[%s1274_s3 + $0x30] sm:$0xff]   ;;  %v1125_v19 = vld [vmem:[%s1274_s3 + $0x28] sm:$0xff]  }
  0x27   :  { %970 = vmatprep.subr.bf16.mxu1 %v1084_v25  ;;  %v40_v12 = vld [vmem:[%s1271_s0 + $0x20] sm:$0xff]  ;;  %v1127_v21 = vld [vmem:[%s1274_s3 + $0x18] sm:$0xff]   ;;  %v1128_v22 = vld [vmem:[%s1274_s3 + $0x10] sm:$0xff]  }
  0x28   :  { %v48_v14 = vpack.c.bf16 %v40_v12, %v40_v12  ;;  %v1126_v20 = vld [vmem:[%s1274_s3 + $0x20] sm:$0xff]   ;;  %v1129_v23 = vld [vmem:[%s1274_s3 + $0x8] sm:$0xff]  }
  0x29   :  { %949 = vmatpush3.bf16.msra.mxu0 %v1085_v26  ;;  %v1130_v24 = vld [vmem:[%s1274_s3] sm:$0xff]  }
  0x2a   :  { %971 = vmatpush3.bf16.msra.mxu1 %v1086_v27  ;;  %950 = vmatprep.subr.bf16.mxu0 %v1087_v28  ;;  %v862_v34 = vld [vmem:[%s1273_s2] ss:$0 sm:$0xff] }
  0x2b   :  { %972 = vmatprep.subr.bf16.mxu1 %v1088_v29 }
  0x2d   :  { %951 = vmatpush3.bf16.msra.mxu0 %v1089_v30 }
  0x2e   :  { %973 = vmatpush3.bf16.msra.mxu1 %v1090_v31  ;;  %980 = vmatprep.subr.bf16.mxu0 %v1091_v40 }
  0x2f   :  { %1002 = vmatprep.subr.bf16.mxu1 %v1092_v41 }
  0x30   :  { %604 = vmatmul.mubr.bf16.vlgmr.msra.gmra.mxu0 %v44_v37 }
  0x31   :  { %644 = vmatmul.mubr.bf16.vlgmr.msra.gmra.mxu1 %v46_v39  ;;  %981 = vmatpush3.bf16.msra.mxu0 %v1093_v42 }
  0x32   :  { %1003 = vmatpush3.bf16.msra.mxu1 %v1094_v43  ;;  %982 = vmatprep.subr.bf16.mxu0 %v1095_v44 }
  0x33   :  { %1004 = vmatprep.subr.bf16.mxu1 %v1096_v45  ;;  %683 = vmatprep.mubr.bf16.mxu0 %v49_v10 }
  0x34   :  { %723 = vmatprep.mubr.bf16.mxu1 %v51_v11 }
  0x35   :  { %983 = vmatpush3.bf16.msra.mxu0 %v1097_v46 }
  0x36   :  { %1005 = vmatpush3.bf16.msra.mxu1 %v1098_v47  ;;  %984 = vmatprep.subr.bf16.mxu0 %v1099_v48 }
  0x37   :  { %1006 = vmatprep.subr.bf16.mxu1 %v1100_v49 }
  0x39   :  { %985 = vmatpush3.bf16.msra.mxu0 %v1101_v50 }
  0x3a   :  { %1007 = vmatpush3.bf16.msra.mxu1 %v1102_v51  ;;  %986 = vmatprep.subr.bf16.mxu0 %v1103_v52  ;;  %v927_v52 = vld [vmem:[%s1275_s4] ss:$0 sm:$0xff] }
  0x3b   :  { %1008 = vmatprep.subr.bf16.mxu1 %v1104_v53 }
  0x3d   :  { %987 = vmatpush3.bf16.msra.mxu0 %v1105_v54 }
  0x3e   :  { %1009 = vmatpush3.bf16.msra.mxu1 %v1106_v55  ;;  %988 = vmatprep.subr.bf16.mxu0 %v1107_v56 }
  0x3f   :  { %1010 = vmatprep.subr.bf16.mxu1 %v1108_v57 }
  0x41   :  { %989 = vmatpush3.bf16.msra.mxu0 %v1109_v58 }
  0x42   :  { %1011 = vmatpush3.bf16.msra.mxu1 %v1110_v59  ;;  %990 = vmatprep.subr.bf16.mxu0 %v1111_v60 }
  0x43   :  { %1012 = vmatprep.subr.bf16.mxu1 %v1112_v61 }
  0x45   :  { %991 = vmatpush3.bf16.msra.mxu0 %v1113_v62 }
  0x46   :  { %1013 = vmatpush3.bf16.msra.mxu1 %v1114_v63  ;;  %992 = vmatprep.subr.bf16.mxu0 %v1115_v0 }
  0x47   :  { %1014 = vmatprep.subr.bf16.mxu1 %v1116_v1 }
  0x49   :  { %993 = vmatpush3.bf16.msra.mxu0 %v1117_v2 }
  0x4a   :  { %1015 = vmatpush3.bf16.msra.mxu1 %v1118_v3  ;;  %994 = vmatprep.subr.bf16.mxu0 %v1119_v4 }
  0x4b   :  { %1016 = vmatprep.subr.bf16.mxu1 %v1120_v5 }
  0x4d   :  { %995 = vmatpush3.bf16.msra.mxu0 %v1121_v6 }
  0x4e   :  { %1017 = vmatpush3.bf16.msra.mxu1 %v1122_v7  ;;  %1033 = vmatprep.subr.bf16.mxu0 %v1178_v17 }
  0x50   :  { %684 = vmatmul.mubr.bf16.vlgmr.msra.gmra.mxu0 %v48_v14 }
  0x51   :  { %724 = vmatmul.mubr.bf16.vlgmr.msra.gmra.mxu1 %v50_v15  ;;  %1034 = vmatpush3.bf16.msra.mxu0 %v1123_v16 }
  0x52   :  { %1035 = vmatprep.subr.bf16.mxu0 %v1178_v17  ;;  %1049 = vmatprep.mubr.msk.bf16.mxu0 %vm1179_vm0, %v1178_v17 }
  0x55   :  { %1036 = vmatpush3.bf16.msra.mxu0 %v1124_v18 }
  0x56   :  { %1037 = vmatprep.subr.bf16.mxu0 %v1178_v17 }
  0x59   :  { %1038 = vmatpush3.bf16.msra.mxu0 %v1125_v19 }
  0x5a   :  { %1039 = vmatprep.subr.bf16.mxu0 %v1178_v17 }
  0x5d   :  { %1040 = vmatpush3.bf16.msra.mxu0 %v1126_v20 }
  0x5e   :  { %1041 = vmatprep.subr.bf16.mxu0 %v1178_v17 }
  0x61   :  { %1042 = vmatpush3.bf16.msra.mxu0 %v1127_v21 }
  0x62   :  { %1043 = vmatprep.subr.bf16.mxu0 %v1178_v17 }
  0x65   :  { %1044 = vmatpush3.bf16.msra.mxu0 %v1128_v22 }
  0x66   :  { %1045 = vmatprep.subr.bf16.mxu0 %v1178_v17 }
  0x69   :  { %1046 = vmatpush3.bf16.msra.mxu0 %v1129_v23 }
  0x6a   :  { %1047 = vmatprep.subr.bf16.mxu0 %v1178_v17 }
  0x6d   :  { %1048 = vmatpush3.bf16.msra.mxu0 %v1130_v24 }
  0xf0   :  { %v952_v25 = vpop.f32.mrf.mxu0 }
  0xf1   :  { %v974_v26 = vpop.f32.mrf.mxu1 }
  0xf2   :  { %v953_v27 = vpop.f32.mrf.mxu0 }
  0xf3   :  { %v975_v28 = vpop.f32.mrf.mxu1  ;;  %v954_v33 = vadd.f32 %v953_v27, %v952_v25 }
  0xf4   :  { %v955_v29 = vpop.f32.mrf.mxu0  ;;  %v976_v36 = vadd.f32 %v975_v28, %v974_v26 }
  0xf5   :  { %v977_v30 = vpop.f32.mrf.mxu1  ;;  %v606_v35 = vadd.f32 %v954_v33, %v862_v34 }
  0xf6   :  { %v956_v31 = vpop.f32.mrf.mxu0 }
  0xf7   :  { %v978_v32 = vpop.f32.mrf.mxu1  ;;  %v646_v40 = vadd.f32 %v976_v36, %v606_v35 }
 0x110   :  { %v996_v37 = vpop.f32.mrf.mxu0 }
 0x111   :  { %v1018_v38 = vpop.f32.mrf.mxu1 }
 0x112   :  { %v997_v39 = vpop.f32.mrf.mxu0 }
 0x113   :  { %v998_v41 = vadd.f32 %v997_v39, %v996_v37  ;;  %v1019_v42 = vpop.f32.mrf.mxu1 }
 0x114   :  { %v999_v43 = vpop.f32.mrf.mxu0  ;;  %v1020_v45 = vadd.f32 %v1019_v42, %v1018_v38 }
 0x115   :  { %v686_v44 = vadd.f32 %v998_v41, %v646_v40  ;;  %v1021_v46 = vpop.f32.mrf.mxu1 }
 0x116   :  { %v1000_v47 = vpop.f32.mrf.mxu0 }
 0x117   :  { %v726_v48 = vadd.f32 %v1020_v45, %v686_v44  ;;  %v1022_v49 = vpop.f32.mrf.mxu1 }
 0x119   :  { %v731_v50 = vmax.f32 %v726_v48, 0.0 }
 0x11b   :  { %v732_v51 = vpack.c.bf16 %v731_v50, %v731_v50 }
 0x11d   :  { %1050 = vmatmul.mubr.bf16.vlgmr.msra.gmra.mxu0 %v732_v51 }
 0x1dd   :  { %v838_v53 = vpop.f32.mrf.mxu0 }
 0x1de   :  { %v839_v54 = vadd.f32 %v927_v52, %v838_v53 }
 0x1df   :  { %v1051_v55 = vpop.f32.mrf.mxu0 }
 0x1e0   :  { %v844_v56 = vmax.f32 %v839_v54, 0.0 }
 0x1e1   :  { %v841_v57 = vpop.f32.mrf.mxu0 }
 0x1e2   :  { %846 = vst.msk [vmem:[#allocation5] sm:$0xff] %vm845_vm1, %v844_v56 }
 0x1e3   :  { %v1052_v58 = vpop.f32.mrf.mxu0 }
 0x1e4   :  { %1162 = shalt.err (!%p1159_p9)
}
 0x1e5   :  { %856 = dma.vmem_to_hbm [thread:$0]  %s854_s7, 128, %s1276_s5, [#allocation4]  }
 0x1e6   :  { %1173 = dma.done.wait [#allocation4], 128  }
 0x1e7   :  { %1174 = vsyncadd [#allocation4], 4294967168 }
 0x1e8   :  { %860 = vsyncpa [#allocation3], 1 }
 0x1e9   :  { %861 = vsyncpa [#allocation4], 1 }

</bundles_post_ra>
